<compile_context>
chip_gen: v6e
topology: v6e:2x2x1
jax: 0.10.0
libtpu: 0.0.40
codegen_flags: <defaults>
</compile_context>

<pallas_src>
import functools

import jax
import jax.numpy as jnp
from jax import lax
from jax.experimental import pallas as pl
from jax.experimental.pallas import tpu as pltpu


def _round_up(x, m):
    return ((x + m - 1) // m) * m


def gate_add_norm_kernel(x_ref, resid_ref, w_ref, p_ref, o_ref, *, out_dim, dp, eps):
    # x_ref:     (tm, d_model)         MXU dtype (bf16 by default)
    # resid_ref: (tm, out_dim)         natural feature width
    # w_ref:     (d_model, 2*dp)       columns [W1 | pad | W2 | pad], dp = roundup(out_dim, 128)
    # p_ref:     (4, dp) f32           rows [b1, b2, gamma, beta]
    # o_ref:     (tm, out_dim)

    # One fused MXU pass for both GLU projections; accumulate in f32.
    y = jnp.dot(x_ref[...], w_ref[...], preferred_element_type=jnp.float32)

    p = p_ref[...]
    out1 = y[:, :out_dim] + p[0:1, :out_dim]                 # lane-aligned slice
    out2 = y[:, dp:dp + out_dim] + p[1:2, :out_dim]          # lane-aligned slice

    # GLU + residual add, f32 epilogue, natural feature width.
    z = jax.nn.sigmoid(out1) * out2 + resid_ref[...].astype(jnp.float32)

    # LayerNorm over exactly out_dim columns (no iota / masking needed).
    inv_d = 1.0 / out_dim
    mean = jnp.sum(z, axis=-1, keepdims=True) * inv_d
    diff = z - mean
    var = jnp.sum(diff * diff, axis=-1, keepdims=True) * inv_d
    z_hat = diff * lax.rsqrt(var + eps)

    o_ref[...] = (z_hat * p[2:3, :out_dim] + p[3:4, :out_dim]).astype(o_ref.dtype)


def pack_gate_add_norm_params(w1, b1, w2, b2, gamma, beta, *, mxu_dtype=jnp.bfloat16):
    """Fuse W1/W2 into one lane-padded MXU weight and pack per-feature params.

    Call once at init — hoisted out of the per-step path so the (d_model, 2*dp)
    weight is not re-packed (re-read/re-written in HBM) every invocation.
    """
    d_model, out_dim = w1.shape
    dp = _round_up(out_dim, 128)

    w_cat = jnp.zeros((d_model, 2 * dp), mxu_dtype)
    w_cat = w_cat.at[:, :out_dim].set(w1.astype(mxu_dtype))
    w_cat = w_cat.at[:, dp:dp + out_dim].set(w2.astype(mxu_dtype))

    params = jnp.zeros((4, dp), jnp.float32)
    params = params.at[0, :out_dim].set(b1.astype(jnp.float32))
    params = params.at[1, :out_dim].set(b2.astype(jnp.float32))
    params = params.at[2, :out_dim].set(gamma.astype(jnp.float32))
    params = params.at[3, :out_dim].set(beta.astype(jnp.float32))
    return w_cat, params


def _vmem_capacity_bytes():
    try:
        return int(pltpu.get_tpu_info().vmem_capacity_bytes)
    except Exception:
        return 64 << 20  # conservative fallback: v7x per-TensorCore VMEM


def gate_add_norm(x, resid, w_cat, params, *, tm=512, eps=1e-5):
    """x: (B, S, d_model), resid: (B, S, out_dim) -> (B, S, out_dim).

    w_cat / params come from pack_gate_add_norm_params (packed once at init).
    """
    B, S, d_model = x.shape
    out_dim = resid.shape[-1]
    dp = params.shape[-1]
    assert w_cat.shape == (d_model, 2 * dp)
    N = B * S

    mxu_dtype = w_cat.dtype
    out_dtype = x.dtype

    # Feed the MXU in the (usually bf16) weight dtype; accumulation stays f32.
    # Under jit this cast fuses into the producer of x.
    x2 = x.reshape(N, d_model).astype(mxu_dtype)
    r2 = resid.reshape(N, out_dim)

    # Row tile: aim for >=2 grid steps when possible (v7x: 2 TensorCores share
    # the "parallel" axis). Ragged last block is handled by Pallas — no padding.
    tm = max(8, min(tm, _round_up(pl.cdiv(N, 2), 8)))

    # VMEM budget: double-buffered row tiles + resident weights (counted
    # double-buffered as worst case) + f32 intermediates + headroom; cap well
    # below physical VMEM and shrink the row tile until it fits.
    # NOTE: for very large d_model * dp (weights >~16 MiB on v7x), a K grid
    # axis with an f32 accumulator would be needed; typical GateAddNorm dims
    # keep the fused weight comfortably resident.
    cap = int(0.8 * _vmem_capacity_bytes())
    xi = jnp.dtype(mxu_dtype).itemsize
    ri = jnp.dtype(r2.dtype).itemsize
    oi = jnp.dtype(out_dtype).itemsize
    w_bytes = 2 * (d_model * 2 * dp * xi + 4 * dp * 4)

    def need(tm_):
        tiles = 2 * tm_ * (d_model * xi + out_dim * ri + out_dim * oi)
        interm = tm_ * 2 * dp * 4 + 4 * tm_ * max(out_dim, 128) * 4
        return tiles + w_bytes + interm + (4 << 20)

    while need(tm) > cap and tm > 64:
        tm = max(64, _round_up(tm // 2, 8))
    vmem_limit = int(min(max(need(tm), 32 << 20), cap))

    grid = pl.cdiv(N, tm)
    kernel = functools.partial(gate_add_norm_kernel, out_dim=out_dim, dp=dp, eps=eps)

    def make_call(single_buffer_consts):
        const_kw = {"pipeline_mode": pl.Buffered(1)} if single_buffer_consts else {}
        in_specs = [
            pl.BlockSpec((tm, d_model), lambda i: (i, 0)),                   # x rows
            pl.BlockSpec((tm, out_dim), lambda i: (i, 0)),                   # resid rows
            pl.BlockSpec((d_model, 2 * dp), lambda i: (0, 0), **const_kw),   # fused W1|W2
            pl.BlockSpec((4, dp), lambda i: (0, 0), **const_kw),             # b1,b2,gamma,beta
        ]
        return pl.pallas_call(
            kernel,
            out_shape=jax.ShapeDtypeStruct((N, out_dim), out_dtype),
            grid_spec=pltpu.PrefetchScalarGridSpec(
                num_scalar_prefetch=0,
                grid=(grid,),
                in_specs=in_specs,
                out_specs=pl.BlockSpec((tm, out_dim), lambda i: (i, 0)),
            ),
            compiler_params=pltpu.CompilerParams(
                dimension_semantics=("parallel",),
                vmem_limit_bytes=vmem_limit),
        )

    try:
        out = make_call(True)(x2, r2, w_cat, params)
    except Exception:
        # Some Pallas versions reject single-buffered constant blocks; fall
        # back to default buffering (correctness unaffected, only VMEM use).
        out = make_call(False)(x2, r2, w_cat, params)

    return out.reshape(B, S, out_dim)


if __name__ == "__main__":
    B, S, d_model, output_dim = 2, 8, 32, 32

    key = jax.random.PRNGKey(0)
    k_x, k_r, k_w1, k_b1, k_w2, k_b2 = jax.random.split(key, 6)

    x = jax.random.normal(k_x, (B, S, d_model), dtype=jnp.float32)
    resid = jax.random.normal(k_r, (B, S, output_dim), dtype=jnp.float32)

    # Linear weights stored as (d_model, output_dim), i.e. transposed relative
    # to PyTorch's (out, in), so the kernel computes x @ W.
    bound = 1.0 / (d_model ** 0.5)
    w1 = jax.random.uniform(k_w1, (d_model, output_dim), jnp.float32, -bound, bound)
    b1 = jax.random.uniform(k_b1, (output_dim,), jnp.float32, -bound, bound)
    w2 = jax.random.uniform(k_w2, (d_model, output_dim), jnp.float32, -bound, bound)
    b2 = jax.random.uniform(k_b2, (output_dim,), jnp.float32, -bound, bound)
    gamma = jnp.ones((output_dim,), jnp.float32)   # nn.LayerNorm default weight
    beta = jnp.zeros((output_dim,), jnp.float32)   # nn.LayerNorm default bias

    # Pack / fuse weights once (hoisted out of the per-step path).
    w_cat, params = pack_gate_add_norm_params(w1, b1, w2, b2, gamma, beta)

    out = gate_add_norm(x, resid, w_cat, params)
    out = jax.block_until_ready(out)

    # Reference 1: same bf16 MXU feed + f32 epilogue (apples-to-apples, tight).
    xb = x.astype(jnp.bfloat16)
    o1 = jnp.dot(xb, w1.astype(jnp.bfloat16), preferred_element_type=jnp.float32) + b1
    o2 = jnp.dot(xb, w2.astype(jnp.bfloat16), preferred_element_type=jnp.float32) + b2
    y = jax.nn.sigmoid(o1) * o2 + resid
    mu = y.mean(-1, keepdims=True)
    var = ((y - mu) ** 2).mean(-1, keepdims=True)
    ref_bf16 = (y - mu) / jnp.sqrt(var + 1e-5) * gamma + beta
    assert jnp.allclose(out, ref_bf16, atol=5e-4, rtol=5e-4), "mismatch vs bf16-feed reference"

    # Reference 2: pure-f32 PyTorch math (loose: bf16 MXU feed is the only delta).
    o1f = x @ w1 + b1
    o2f = x @ w2 + b2
    yf = jax.nn.sigmoid(o1f) * o2f + resid
    muf = yf.mean(-1, keepdims=True)
    varf = ((yf - muf) ** 2).mean(-1, keepdims=True)
    ref_f32 = (yf - muf) / jnp.sqrt(varf + 1e-5) * gamma + beta
    assert jnp.allclose(out, ref_f32, atol=3e-2, rtol=3e-2), "mismatch vs f32 reference"

    print("KERNEL_OK")
</pallas_src>

<mosaic_0001>
module attributes {stable_mosaic.version = 11 : i64} {
  func.func @gate_add_norm_kernel(%arg0: i32, %arg1: memref<8x32xbf16, #tpu.memory_space<vmem>>, %arg2: memref<8x32xf32, #tpu.memory_space<vmem>>, %arg3: memref<32x256xbf16, #tpu.memory_space<vmem>>, %arg4: memref<4x128xf32, #tpu.memory_space<vmem>>, %arg5: memref<8x32xf32, #tpu.memory_space<vmem>>) attributes {dimension_semantics = [#tpu.dimension_semantics<parallel>], iteration_bounds = array<i64: 2>, scalar_prefetch = 0 : i64, scratch_operands = 0 : i64, tpu.core_type = #tpu.core_type<tc>, window_params = [{transform_indices = @transform_0, window_bounds = array<i64: 8, 32>}, {transform_indices = @transform_1, window_bounds = array<i64: 8, 32>}, {pipeline_mode = #tpu.pipeline_mode<synchronous>, transform_indices = @transform_2, window_bounds = array<i64: 32, 256>}, {pipeline_mode = #tpu.pipeline_mode<synchronous>, transform_indices = @transform_3, window_bounds = array<i64: 4, 128>}, {transform_indices = @transform_4, window_bounds = array<i64: 8, 32>}]} {
    %c0 = arith.constant 0 : index
    %c0_0 = arith.constant 0 : index
    %0 = vector.load %arg1[%c0, %c0_0] : memref<8x32xbf16, #tpu.memory_space<vmem>>, vector<8x32xbf16>
    %c0_1 = arith.constant 0 : index
    %c0_2 = arith.constant 0 : index
    %1 = vector.load %arg3[%c0_1, %c0_2] : memref<32x256xbf16, #tpu.memory_space<vmem>>, vector<32x256xbf16>
    %cst = arith.constant dense<0.000000e+00> : vector<8x256xf32>
    %2 = tpu.matmul %0, %1, %cst {dimension_numbers = #tpu.dot_dimension_numbers<[1], [0], [0], [1], [0, 0, 1, 1], [], []>} : vector<8x32xbf16>, vector<32x256xbf16>, vector<8x256xf32> -> vector<8x256xf32>
    %c0_3 = arith.constant 0 : index
    %c0_4 = arith.constant 0 : index
    %3 = vector.load %arg4[%c0_3, %c0_4] : memref<4x128xf32, #tpu.memory_space<vmem>>, vector<4x128xf32>
    %4 = vector.extract_strided_slice %2 {offsets = [0, 0], sizes = [8, 32], strides = [1, 1]} : vector<8x256xf32> to vector<8x32xf32>
    %5 = vector.extract_strided_slice %3 {offsets = [0, 0], sizes = [1, 32], strides = [1, 1]} : vector<4x128xf32> to vector<1x32xf32>
    %6 = vector.broadcast %5 : vector<1x32xf32> to vector<8x32xf32>
    %7 = arith.addf %4, %6 : vector<8x32xf32>
    %8 = vector.extract_strided_slice %2 {offsets = [0, 128], sizes = [8, 32], strides = [1, 1]} : vector<8x256xf32> to vector<8x32xf32>
    %9 = vector.extract_strided_slice %3 {offsets = [1, 0], sizes = [1, 32], strides = [1, 1]} : vector<4x128xf32> to vector<1x32xf32>
    %10 = vector.broadcast %9 : vector<1x32xf32> to vector<8x32xf32>
    %11 = arith.addf %8, %10 : vector<8x32xf32>
    %12 = arith.negf %7 : vector<8x32xf32>
    %13 = math.exp %12 : vector<8x32xf32>
    %cst_5 = arith.constant 1.000000e+00 : f32
    %14 = vector.broadcast %cst_5 : f32 to vector<8x32xf32>
    %15 = arith.addf %14, %13 : vector<8x32xf32>
    %16 = arith.divf %14, %15 : vector<8x32xf32>
    %17 = arith.mulf %16, %11 : vector<8x32xf32>
    %c0_6 = arith.constant 0 : index
    %c0_7 = arith.constant 0 : index
    %18 = vector.load %arg2[%c0_6, %c0_7] : memref<8x32xf32, #tpu.memory_space<vmem>>, vector<8x32xf32>
    %19 = arith.addf %17, %18 : vector<8x32xf32>
    %cst_8 = arith.constant dense<0.000000e+00> : vector<8xf32>
    %20 = vector.multi_reduction <add>, %19, %cst_8 [1] : vector<8x32xf32> to vector<8xf32>
    %21 = vector.shape_cast %20 : vector<8xf32> to vector<8x1xf32>
    %cst_9 = arith.constant 3.125000e-02 : f32
    %22 = vector.broadcast %cst_9 : f32 to vector<8x1xf32>
    %23 = arith.mulf %21, %22 : vector<8x1xf32>
    %24 = vector.broadcast %23 : vector<8x1xf32> to vector<8x32xf32>
    %25 = arith.subf %19, %24 : vector<8x32xf32>
    %26 = arith.mulf %25, %25 : vector<8x32xf32>
    %cst_10 = arith.constant dense<0.000000e+00> : vector<8xf32>
    %27 = vector.multi_reduction <add>, %26, %cst_10 [1] : vector<8x32xf32> to vector<8xf32>
    %28 = vector.shape_cast %27 : vector<8xf32> to vector<8x1xf32>
    %cst_11 = arith.constant 3.125000e-02 : f32
    %29 = vector.broadcast %cst_11 : f32 to vector<8x1xf32>
    %30 = arith.mulf %28, %29 : vector<8x1xf32>
    %cst_12 = arith.constant 9.99999974E-6 : f32
    %31 = vector.broadcast %cst_12 : f32 to vector<8x1xf32>
    %32 = arith.addf %30, %31 : vector<8x1xf32>
    %33 = math.rsqrt %32 : vector<8x1xf32>
    %34 = vector.broadcast %33 : vector<8x1xf32> to vector<8x32xf32>
    %35 = arith.mulf %25, %34 : vector<8x32xf32>
    %36 = vector.extract_strided_slice %3 {offsets = [2, 0], sizes = [1, 32], strides = [1, 1]} : vector<4x128xf32> to vector<1x32xf32>
    %37 = vector.broadcast %36 : vector<1x32xf32> to vector<8x32xf32>
    %38 = arith.mulf %35, %37 : vector<8x32xf32>
    %39 = vector.extract_strided_slice %3 {offsets = [3, 0], sizes = [1, 32], strides = [1, 1]} : vector<4x128xf32> to vector<1x32xf32>
    %40 = vector.broadcast %39 : vector<1x32xf32> to vector<8x32xf32>
    %41 = arith.addf %38, %40 : vector<8x32xf32>
    %c0_13 = arith.constant 0 : index
    %c0_14 = arith.constant 0 : index
    %42 = vector.load %arg5[%c0_13, %c0_14] : memref<8x32xf32, #tpu.memory_space<vmem>>, vector<8x32xf32>
    tpu.vector_store %arg5[%c0_13, %c0_14], %41 {strides = array<i32>} : memref<8x32xf32, #tpu.memory_space<vmem>>, vector<8x32xf32>,
    return
  }
  func.func @transform_0(%arg0: i32) -> (i32, i32) {
    %c0_i32 = arith.constant 0 : i32
    %c0_i32_0 = arith.constant 0 : i32
    return %arg0, %c0_i32 : i32, i32
  }
  func.func @transform_1(%arg0: i32) -> (i32, i32) {
    %c0_i32 = arith.constant 0 : i32
    %c0_i32_0 = arith.constant 0 : i32
    return %arg0, %c0_i32 : i32, i32
  }
  func.func @transform_2(%arg0: i32) -> (i32, i32) {
    %c0_i32 = arith.constant 0 : i32
    %c0_i32_0 = arith.constant 0 : i32
    %c0_i32_1 = arith.constant 0 : i32
    return %c0_i32, %c0_i32_0 : i32, i32
  }
  func.func @transform_3(%arg0: i32) -> (i32, i32) {
    %c0_i32 = arith.constant 0 : i32
    %c0_i32_0 = arith.constant 0 : i32
    %c0_i32_1 = arith.constant 0 : i32
    return %c0_i32, %c0_i32_0 : i32, i32
  }
  func.func @transform_4(%arg0: i32) -> (i32, i32) {
    %c0_i32 = arith.constant 0 : i32
    %c0_i32_0 = arith.constant 0 : i32
    return %arg0, %c0_i32 : i32, i32
  }
}

module attributes {stable_mosaic.version = 11 : i64} {
  func.func @gate_add_norm_kernel(%arg0: i32, %arg1: memref<8x32xbf16, #tpu.memory_space<vmem>>, %arg2: memref<8x32xf32, #tpu.memory_space<vmem>>, %arg3: memref<32x256xbf16, #tpu.memory_space<vmem>>, %arg4: memref<4x128xf32, #tpu.memory_space<vmem>>, %arg5: memref<8x32xf32, #tpu.memory_space<vmem>>) attributes {dimension_semantics = [#tpu.dimension_semantics<parallel>], iteration_bounds = array<i64: 2>, scalar_prefetch = 0 : i64, scratch_operands = 0 : i64, tpu.core_type = #tpu.core_type<tc>, window_params = [{transform_indices = @transform_0, window_bounds = array<i64: 8, 32>}, {transform_indices = @transform_1, window_bounds = array<i64: 8, 32>}, {pipeline_mode = #tpu.pipeline_mode<synchronous>, transform_indices = @transform_2, window_bounds = array<i64: 32, 256>}, {pipeline_mode = #tpu.pipeline_mode<synchronous>, transform_indices = @transform_3, window_bounds = array<i64: 4, 128>}, {transform_indices = @transform_4, window_bounds = array<i64: 8, 32>}]} {
    %c0 = arith.constant 0 : index
    %c0_0 = arith.constant 0 : index
    %0 = vector.load %arg1[%c0, %c0_0] : memref<8x32xbf16, #tpu.memory_space<vmem>>, vector<8x32xbf16>
    %c0_1 = arith.constant 0 : index
    %c0_2 = arith.constant 0 : index
    %1 = vector.load %arg3[%c0_1, %c0_2] : memref<32x256xbf16, #tpu.memory_space<vmem>>, vector<32x256xbf16>
    %cst = arith.constant dense<0.000000e+00> : vector<8x256xf32>
    %2 = tpu.matmul %0, %1, %cst {dimension_numbers = #tpu.dot_dimension_numbers<[1], [0], [0], [1], [0, 0, 1, 1], [], []>} : vector<8x32xbf16>, vector<32x256xbf16>, vector<8x256xf32> -> vector<8x256xf32>
    %c0_3 = arith.constant 0 : index
    %c0_4 = arith.constant 0 : index
    %3 = vector.load %arg4[%c0_3, %c0_4] : memref<4x128xf32, #tpu.memory_space<vmem>>, vector<4x128xf32>
    %4 = vector.extract_strided_slice %2 {offsets = [0, 0], sizes = [8, 32], strides = [1, 1]} : vector<8x256xf32> to vector<8x32xf32>
    %5 = vector.extract_strided_slice %3 {offsets = [0, 0], sizes = [1, 32], strides = [1, 1]} : vector<4x128xf32> to vector<1x32xf32>
    %6 = vector.broadcast %5 : vector<1x32xf32> to vector<8x32xf32>
    %7 = arith.addf %4, %6 : vector<8x32xf32>
    %8 = vector.extract_strided_slice %2 {offsets = [0, 128], sizes = [8, 32], strides = [1, 1]} : vector<8x256xf32> to vector<8x32xf32>
    %9 = vector.extract_strided_slice %3 {offsets = [1, 0], sizes = [1, 32], strides = [1, 1]} : vector<4x128xf32> to vector<1x32xf32>
    %10 = vector.broadcast %9 : vector<1x32xf32> to vector<8x32xf32>
    %11 = arith.addf %8, %10 : vector<8x32xf32>
    %12 = arith.negf %7 : vector<8x32xf32>
    %13 = math.exp %12 : vector<8x32xf32>
    %cst_5 = arith.constant 1.000000e+00 : f32
    %14 = vector.broadcast %cst_5 : f32 to vector<8x32xf32>
    %15 = arith.addf %14, %13 : vector<8x32xf32>
    %16 = arith.divf %14, %15 : vector<8x32xf32>
    %17 = arith.mulf %16, %11 : vector<8x32xf32>
    %c0_6 = arith.constant 0 : index
    %c0_7 = arith.constant 0 : index
    %18 = vector.load %arg2[%c0_6, %c0_7] : memref<8x32xf32, #tpu.memory_space<vmem>>, vector<8x32xf32>
    %19 = arith.addf %17, %18 : vector<8x32xf32>
    %cst_8 = arith.constant dense<0.000000e+00> : vector<8xf32>
    %20 = vector.multi_reduction <add>, %19, %cst_8 [1] : vector<8x32xf32> to vector<8xf32>
    %21 = vector.shape_cast %20 : vector<8xf32> to vector<8x1xf32>
    %cst_9 = arith.constant 3.125000e-02 : f32
    %22 = vector.broadcast %cst_9 : f32 to vector<8x1xf32>
    %23 = arith.mulf %21, %22 : vector<8x1xf32>
    %24 = vector.broadcast %23 : vector<8x1xf32> to vector<8x32xf32>
    %25 = arith.subf %19, %24 : vector<8x32xf32>
    %26 = arith.mulf %25, %25 : vector<8x32xf32>
    %cst_10 = arith.constant dense<0.000000e+00> : vector<8xf32>
    %27 = vector.multi_reduction <add>, %26, %cst_10 [1] : vector<8x32xf32> to vector<8xf32>
    %28 = vector.shape_cast %27 : vector<8xf32> to vector<8x1xf32>
    %cst_11 = arith.constant 3.125000e-02 : f32
    %29 = vector.broadcast %cst_11 : f32 to vector<8x1xf32>
    %30 = arith.mulf %28, %29 : vector<8x1xf32>
    %cst_12 = arith.constant 9.99999974E-6 : f32
    %31 = vector.broadcast %cst_12 : f32 to vector<8x1xf32>
    %32 = arith.addf %30, %31 : vector<8x1xf32>
    %33 = math.rsqrt %32 : vector<8x1xf32>
    %34 = vector.broadcast %33 : vector<8x1xf32> to vector<8x32xf32>
    %35 = arith.mulf %25, %34 : vector<8x32xf32>
    %36 = vector.extract_strided_slice %3 {offsets = [2, 0], sizes = [1, 32], strides = [1, 1]} : vector<4x128xf32> to vector<1x32xf32>
    %37 = vector.broadcast %36 : vector<1x32xf32> to vector<8x32xf32>
    %38 = arith.mulf %35, %37 : vector<8x32xf32>
    %39 = vector.extract_strided_slice %3 {offsets = [3, 0], sizes = [1, 32], strides = [1, 1]} : vector<4x128xf32> to vector<1x32xf32>
    %40 = vector.broadcast %39 : vector<1x32xf32> to vector<8x32xf32>
    %41 = arith.addf %38, %40 : vector<8x32xf32>
    %c0_13 = arith.constant 0 : index
    %c0_14 = arith.constant 0 : index
    %42 = vector.load %arg5[%c0_13, %c0_14] : memref<8x32xf32, #tpu.memory_space<vmem>>, vector<8x32xf32>
    tpu.vector_store %arg5[%c0_13, %c0_14], %41 {strides = array<i32>} : memref<8x32xf32, #tpu.memory_space<vmem>>, vector<8x32xf32>,
    return
  }
  func.func @transform_0(%arg0: i32) -> (i32, i32) {
    %c0_i32 = arith.constant 0 : i32
    %c0_i32_0 = arith.constant 0 : i32
    return %arg0, %c0_i32 : i32, i32
  }
  func.func @transform_1(%arg0: i32) -> (i32, i32) {
    %c0_i32 = arith.constant 0 : i32
    %c0_i32_0 = arith.constant 0 : i32
    return %arg0, %c0_i32 : i32, i32
  }
  func.func @transform_2(%arg0: i32) -> (i32, i32) {
    %c0_i32 = arith.constant 0 : i32
    %c0_i32_0 = arith.constant 0 : i32
    %c0_i32_1 = arith.constant 0 : i32
    return %c0_i32, %c0_i32_0 : i32, i32
  }
  func.func @transform_3(%arg0: i32) -> (i32, i32) {
    %c0_i32 = arith.constant 0 : i32
    %c0_i32_0 = arith.constant 0 : i32
    %c0_i32_1 = arith.constant 0 : i32
    return %c0_i32, %c0_i32_0 : i32, i32
  }
  func.func @transform_4(%arg0: i32) -> (i32, i32) {
    %c0_i32 = arith.constant 0 : i32
    %c0_i32_0 = arith.constant 0 : i32
    return %arg0, %c0_i32 : i32, i32
  }
}

</mosaic_0001>

<bundles_post_ra>
// kernel: tpu_custom_call.1
= control target key start
LH: loop header
LB: loop body
LE: loop exit
PB: predicated region body
PF: predicated region fallthrough
CT: control target
= control target key end

     0   :  { %9 = vsyncpa [#allocation3], 0  ;;  %s995_s0 = inlined_call_operand.hbm [shape: bf16[16,32], index: 0, kind: input, shape index: {}]   ;;  %s996_s1 = inlined_call_operand.hbm [shape: f32[16,32], index: 1, kind: input, shape index: {}]   ;;  %s997_s2 = inlined_call_operand.hbm [shape: bf16[32,256], index: 2, kind: input, shape index: {}]   ;;  %s998_s3 = inlined_call_operand.vmem [shape: f32[4,128], index: 3, kind: input, shape index: {}]   ;;  %s999_s4 = inlined_call_operand.hbm [shape: f32[16,32], index: 4, kind: output, shape index: {}]  }
   0x1   :  { %11 = vsyncpa [#allocation3 + $0x1], 0 }
   0x2   :  { %12 = vsyncpa [#allocation6], 0 }
   0x3   :  { %14 = vsyncpa [#allocation6 + $0x1], 0 }
   0x4   :  { %15 = vsyncpa [#allocation4], 0 }
   0x5   :  { %17 = vsyncpa [#allocation4 + $0x1], 0  ;;  %s783_s15 = smov 0   ;;  %s785_s16 = smov 0  }
   0x6   :  { %s787_s17 = smov 0   ;;  %s789_s18 = smov 0  }
   0x7 LB: > { %s804_s19 = sadd.s32 4294967295, %s749_s18   ;;  %s495_s20 = sadd.s32 4294967294, %s749_s18   ;;  %s749_s18 = sphi %s789_s18, %s1021_s18   ;;  %s745_s17 = sphi %s787_s17, %s1020_s17   ;;  %s741_s16 = sphi %s785_s16, %s1019_s16   ;;  %s737_s15 = sphi %s783_s15, %s1018_s15  }
   0x8   : > { %p43_p0 = scmp.ne.s32.totalorder %s741_s16, %s737_s15  ;;  %p1000_p1 = scmp.eq.s32.totalorder %s804_s19, 0 }
   0x9   : > { %p141_p3 = scmp.eq.s32.totalorder %s495_s20, 1  ;;  %p496_p5 = scmp.ge.s32.totalorder %s749_s18, 1 }
   0xa   : > { %p813_p4 = por %p1000_p1, %p43_p0  ;;  %p148_p7 = scmp.lt.s32.totalorder %s749_s18, 3 }
   0xb   : > { %p818_p6 = por %p141_p3, %p43_p0  ;;  %s751_s24 = smov [#allocation7]  }
   0xc   : > { %s1004_s21 = scalar_select %p813_p4, 1, 0 }
   0xd   : > { %s1005_s22 = scalar_select %p818_p6, 1, 0 }
   0xe   : > { %p823_p8 = pnand %p496_p5, %p148_p7  ;;  %s160_s25 = sshll.u32 %s751_s24, 4  ;;  %s161_s25 = int_to_ptr.vmem [resolvable:$true] %s160_s25 }
   0xf   : > { %s837_s27 = sadd.s32 1, %s749_s18   ;;  %s30_s28 = sadd.s32 1, %s745_s17 }
  0x10   : > { %s1006_s23 = scalar_select %p823_p8, 1, 0 }
  0x11   : > { %p528_p9 = pneg %p823_p8  ;;  %s27_s29 = ssub.s32 %s749_s18, %s837_s27 }
  0x12   : > { %s606_s30 = scalar_lea.vmem %s161_s25, 512  ;;  %p614_p5 = scmp.lt.s32.totalorder %s161_s25, %s161_s25 }
  0x13   : > { %p832_p11 = pnand %p528_p9, %p1000_p1  ;;  %p607_p13 = scmp.ne.s32.totalorder %s161_s25, %s606_s30 }
  0x14   : > { %p615_p7 = scmp.lt.s32.totalorder %s606_s30, %s606_s30 }
  0x15   : > { %p597_p12 = pneg %p832_p11 }
  0x16   : > { %p616_p10 = por %p615_p7, %p614_p5 }
  0x17   : > { %p609_p0 = pnand %p607_p13, %p597_p12 }
  0x19   : > { %p610_p3 = pneg %p609_p0 }
  0x1b   : > { %p617_p2 = pnand %p616_p10, %p610_p3 }
  0x1d   : > { %620 = shalt.err (!%p617_p2)
}
  0x1e   : > { %s752_s5 = smov 128   ;;  %s753_s6 = smov 8  }
  0x1f   : > { %531 = dma.hbm_to_vmem [thread:$0]  (!%p832_p11), %s997_s2, 512, %s161_s25, [#allocation6], %s752_s5, %s752_s5, %s753_s6  }
  0x20   : > { %p28_p9 = scmp.eq.s32.totalorder %s27_s29, 0  ;;  %p37_p10 = scmp.ne.s32.totalorder %s745_s17, %s741_s16 }
  0x21   : > { %p38_p2 = scmp.eq.s32.totalorder %s749_s18, 0  ;;  %p544_p12 = scmp.lt.s32.totalorder %s749_s18, 2 }
  0x22   : > { %s854_s9 = scalar_select %p28_p9, %s745_s17, %s30_s28  }
  0x23   : > { %p39_p13 = por %p38_p2, %p37_p10  ;;  %p1008_p0 = scmp.eq.s32.totalorder %s804_s19, 1 }
  0x24   : > { %s863_s11 = sand.u32 1, %s745_s17   ;;  %s500_s12 = sshll.u32 %s749_s18, 6 }
  0x25   : > { %p858_p3 = por %p1008_p0, %p37_p10  ;;  %s499_s13 = sshll.u32 %s863_s11, 2 }
  0x26   : > { %s870_s24 = scalar_lea.hbm %s995_s0, %s500_s12  ;;  %s181_s25 = scalar_lea.vmem [#allocation2], %s499_s13 }
  0x27   : > { %s1009_s10 = scalar_select %p858_p3, 1, 0 }
  0x28   : > { %s188_s26 = sshll.u32 %s181_s25, 4  ;;  %p872_p11 = pnand %p544_p12, %p39_p13  ;;  %s189_s26 = int_to_ptr.vmem [resolvable:$true] %s188_s26 }
  0x29   : > { %s195_s29 = sand.u32 1, %s749_s18   ;;  %s178_s30 = scalar_lea.sflag [#allocation3], %s863_s11 }
  0x2a   : > { %s621_s5 = scalar_lea.hbm %s870_s24, 64  ;;  %p623_p7 = pneg %p872_p11 }
  0x2b   : > { %p622_p5 = scmp.ne.s32.totalorder %s870_s24, %s621_s5  ;;  %s626_s8 = scalar_lea.hbm %s995_s0, 128 }
  0x2c   : > { %p627_p2 = scmp.lt.s32.totalorder %s870_s24, %s995_s0  ;;  %p628_p12 = scmp.lt.s32.totalorder %s626_s8, %s621_s5 }
  0x2d   : > { %p624_p9 = pnand %p623_p7, %p622_p5 }
  0x2e   : > { %p629_p13 = por %p628_p12, %p627_p2 }
  0x2f   : > { %p625_p10 = pneg %p624_p9 }
  0x31   : > { %p630_p0 = pnand %p629_p13, %p625_p10 }
  0x33   : > { %633 = shalt.err (!%p630_p0)
}
  0x34   : > { %s634_s14 = scalar_lea.vmem %s189_s26, 64  ;;  %s754_s20 = smov [#allocation2]  }
  0x35   : > { %p635_p1 = scmp.ne.s32.totalorder %s189_s26, %s634_s14  ;;  %s639_s25 = sshll.u32 %s754_s20, 4  ;;  %s640_s25 = int_to_ptr.vmem [resolvable:$false] %s639_s25 }
  0x36   : > { %s641_s6 = scalar_lea.vmem %s640_s25, 128  ;;  %p642_p9 = scmp.lt.s32.totalorder %s189_s26, %s640_s25 }
  0x37   : > { %p637_p6 = pnand %p635_p1, %p623_p7  ;;  %p643_p3 = scmp.lt.s32.totalorder %s641_s6, %s634_s14 }
  0x39   : > { %p638_p5 = pneg %p637_p6  ;;  %p644_p4 = por %p643_p3, %p642_p9 }
  0x3b   : > { %p645_p8 = pnand %p644_p4, %p638_p5 }
  0x3d   : > { %648 = shalt.err (!%p645_p8)
}
  0x3e   : > { %535 = dma.hbm_to_vmem [thread:$0]  (!%p872_p11), %s870_s24, 64, %s189_s26, %s178_s30  }
  0x3f   : > { %s501_s5 = sshll.u32 %s863_s11, 3  ;;  %s502_s7 = sshll.u32 %s749_s18, 7 }
  0x40   : > { %s903_s13 = scalar_lea.hbm %s996_s1, %s502_s7  ;;  %s199_s14 = scalar_lea.vmem [#allocation5], %s501_s5 }
  0x41   : > { %s206_s20 = sshll.u32 %s199_s14, 4  ;;  %s196_s25 = scalar_lea.sflag [#allocation6], %s195_s29  ;;  %s207_s20 = int_to_ptr.vmem [resolvable:$true] %s206_s20 }
  0x42   : > { %s649_s6 = scalar_lea.hbm %s903_s13, 128  ;;  %s654_s26 = scalar_lea.hbm %s996_s1, 256 }
  0x43   : > { %p650_p1 = scmp.ne.s32.totalorder %s903_s13, %s649_s6  ;;  %p655_p8 = scmp.lt.s32.totalorder %s903_s13, %s996_s1 }
  0x44   : > { %p656_p3 = scmp.lt.s32.totalorder %s654_s26, %s649_s6 }
  0x45   : > { %p652_p4 = pnand %p650_p1, %p623_p7 }
  0x46   : > { %p657_p10 = por %p656_p3, %p655_p8 }
  0x47   : > { %p653_p6 = pneg %p652_p4 }
  0x49   : > { %p658_p2 = pnand %p657_p10, %p653_p6 }
  0x4b   : > { %661 = shalt.err (!%p658_p2)
}
  0x4c   : > { %s662_s5 = scalar_lea.vmem %s207_s20, 128  ;;  %s755_s29 = smov [#allocation5]  }
  0x4d   : > { %p663_p12 = scmp.ne.s32.totalorder %s207_s20, %s662_s5  ;;  %s667_s8 = sshll.u32 %s755_s29, 4  ;;  %s668_s8 = int_to_ptr.vmem [resolvable:$false] %s667_s8 }
  0x4e   : > { %s669_s12 = scalar_lea.vmem %s668_s8, 256  ;;  %p670_p5 = scmp.lt.s32.totalorder %s207_s20, %s668_s8 }
  0x4f   : > { %p665_p13 = pnand %p663_p12, %p623_p7  ;;  %p671_p9 = scmp.lt.s32.totalorder %s669_s12, %s662_s5 }
  0x51   : > { %p666_p0 = pneg %p665_p13  ;;  %p672_p1 = por %p671_p9, %p670_p5 }
  0x53   : > { %p673_p4 = pnand %p672_p1, %p666_p0 }
  0x55   : > { %676 = shalt.err (!%p673_p4)
}
  0x56   : > { %538 = dma.hbm_to_vmem [thread:$0]  (!%p872_p11), %s903_s13, 128, %s207_s20, %s196_s25  }
  0x57   : > { %p1011_p6 = scmp.ne.s32.totalorder %s1006_s23, 0 }
  0x58   : > { %s928_s14 = sand.u32 (!%p1011_p6), 1, %s741_s16   ;;  %p1012_p7 = scmp.ne.s32.totalorder (!%p1011_p6), %s1004_s21, 0 }
  0x59   : > { %215 = sbr.rel (%p1011_p6) target bundleno = 662 (0x296), region = 36  ;;  %s504_s6 = sshll.u32 (!%p1011_p6), %s928_s14, 2 }
  0x5a   : > { %s218_s11 = scalar_lea.sflag (!%p1011_p6), [#allocation3], %s928_s14  ;;  %s221_s24 = scalar_lea.vmem (!%p1011_p6), [#allocation2], %s504_s6 }
  0x5e   : > { %720 = dma.done.wait (%p1012_p7), %s218_s11, 64  }
  0x5f   : > { %722 = vsyncadd (%p1012_p7), %s218_s11, 4294967232  ;;  %s226_s23 = sand.u32 1, %s804_s19   ;;  %s505_s28 = sshll.u32 %s928_s14, 3 }
  0x60   : > { %s227_s13 = scalar_lea.sflag [#allocation6], %s226_s23  ;;  %s940_s20 = scalar_lea.vmem [#allocation5], %s505_s28 }
  0x61   : > { %724 = dma.done.wait (%p1012_p7), %s227_s13, 128  }
  0x62   : > { %726 = vsyncadd (%p1012_p7), %s227_s13, 4294967168  ;;  %p1013_p11 = scmp.eq.s32.totalorder %s804_s19, 0 }
  0x64   : > { %728 = dma.done.wait (%p1013_p11), [#allocation6], 512   ;;  %p1014_p8 = pmov %p1013_p11 }
  0x65   : > { %v756_v0 = vmov 0   ;;  %v583_v1 = vld [vmem:[#allocation7 + $0x14] ss:$8 sps:$4 sm:$0xff]   ;;  %v585_v2 = vld [vmem:[#allocation7 + $0x10] ss:$8 sps:$4 sm:$0xff]   ;;  %vm290_vm0 = vcmask 261120   ;;  %v336_v6 = vlaneseq }
  0x66   : > { %730 = vsyncadd (%p1014_p8), [#allocation6], 4294966784  ;;  %326 = vmatprep.mubr.bf16.mxu0 %v756_v0  ;;  %306 = vmatprep.subr.bf16.mxu0 %v583_v1  ;;  %v586_v3 = vld [vmem:[#allocation7 + $0x4] ss:$8 sps:$4 sm:$0xff]   ;;  %v588_v4 = vld [vmem:[#allocation7] ss:$8 sps:$4 sm:$0xff]  }
  0x67   : > { %307 = vmatpush1.bf16.msra.mxu0 %v585_v2  ;;  %v265_v5 = vld [vmem:[%s221_s24] sm:$0xf]  ;;  %v337_v7 = vshrl.u32 %v336_v6, 7  ;;  %v353_v27 = vld [vmem:[%s940_s20] sm:$0xff]  ;;  %s515_s26 = sshll.u32 %s804_s19, 7  ;;  %s263_s30 = scalar_lea.vmem [#allocation8], %s505_s28 }
  0x68   : > { %308 = vmatprep.subr.bf16.mxu0 %v586_v3  ;;  %v335_v10 = vld [vmem:[%s998_s3] sm:$0xf]  ;;  %s393_s7 = sshll.u32 %s263_s30, 4  ;;  %s391_s8 = scalar_lea.hbm %s999_s4, %s515_s26  ;;  %s394_s7 = int_to_ptr.vmem [resolvable:$true] %s393_s7 }
  0x69   : > { %v370_v8 = vsub.s32 2, %v337_v7  ;;  %v375_v9 = vsub.s32 3, %v337_v7  ;;  %v338_v13 = vsub.s32 0, %v337_v7  ;;  %v343_v23 = vsub.s32 1, %v337_v7  ;;  %s380_s12 = scalar_lea.sflag [#allocation4], %s928_s14  ;;  %s677_s6 = scalar_lea.vmem %s394_s7, 128 }
  0x6a   : > { %p678_p3 = scmp.ne.s32.totalorder %s394_s7, %s677_s6  ;;  %p1015_p10 = scmp.ne.s32.totalorder %s1009_s10, 0 }
  0x6b   : > { %309 = vmatpush1.bf16.msra.mxu0 %v588_v4  ;;  %v371_v11 = vrot.slane %v335_v10, %v370_v8  ;;  %v376_v12 = vrot.slane %v335_v10, %v375_v9  ;;  %v339_v14 = vrot.slane %v335_v10, %v338_v13  ;;  %v344_v24 = vrot.slane %v335_v10, %v343_v23  ;;  %s757_s11 = smov [#allocation8]  }
  0x6c   : > { %p679_p2 = pnand %p678_p3, %p1015_p10  ;;  %s681_s19 = sshll.u32 %s757_s11, 4  ;;  %s682_s19 = int_to_ptr.vmem [resolvable:$false] %s681_s19 }
  0x6d   : > { %s683_s24 = scalar_lea.vmem %s682_s19, 256  ;;  %p684_p13 = scmp.lt.s32.totalorder %s394_s7, %s682_s19 }
  0x6e   : > { %512 = vmatmul.mubr.msk.bf16.vlgmr.msra.gmra.mxu0 %vm290_vm0, %v265_v5  ;;  %p680_p12 = pneg %p679_p2  ;;  %p685_p0 = scmp.lt.s32.totalorder %s683_s24, %s677_s6 }
  0x70   : > { %p686_p5 = por %p685_p0, %p684_p13 }
  0x72   : > { %p687_p9 = pnand %p686_p5, %p680_p12 }
 0x12e   : > { %v328_v15 = vpop.f32.mrf.mxu0 }
 0x12f   : > { %v340_v16 = vadd.f32 %v339_v14, %v328_v15 }
 0x130   : > { %v330_v17 = vpop.f32.mrf.mxu0 }
 0x131   : > { %v513_v18 = vmul.f32 -1.442695, %v340_v16  ;;  %v345_v25 = vadd.f32 %v344_v24, %v330_v17 }
 0x132   : > { %v332_v19 = vpop.f32.mrf.mxu0 }
 0x133   : > { %589 = vpow2.f32 %v513_v18 }
 0x134   : > { %v333_v20 = vpop.f32.mrf.mxu0 }
 0x140   : > { %v590_v21 = vpop.eup %589 }
 0x141   : > { %v349_v22 = vadd.f32 1.0, %v590_v21 }
 0x143   : > { %591 = vrcp.f32 %v349_v22 }
 0x150   : > { %v592_v26 = vpop.eup %591 }
 0x151   : > { %v352_v28 = vmul.f32 %v592_v26, %v345_v25 }
 0x153   : > { %v354_v29 = vadd.f32 %v353_v27, %v352_v28 }
 0x155   : > { %v355_v30 = vsel %vm290_vm0, %v354_v29, 0.0 }
 0x156   : > { %356 = vadd.xlane.f32.xlu0 %v355_v30 }
 0x1df   : > { %v357_v31 = vpop.xlane.xlu0 %356 }
 0x1e0   : > { %v358_v32 = vmul.f32 0.03125, %v357_v31 }
 0x1e2   : > { %v359_v33 = vsub.f32 %v354_v29, %v358_v32 }
 0x1e4   : > { %v360_v34 = vmul.f32 %v359_v33, %v359_v33 }
 0x1e6   : > { %v361_v35 = vsel %vm290_vm0, %v360_v34, 0.0 }
 0x1e7   : > { %362 = vadd.xlane.f32.xlu0 %v361_v35 }
 0x270   : > { %v363_v36 = vpop.xlane.xlu0 %362 }
 0x271   : > { %v364_v37 = vmul.f32 0.03125, %v363_v36 }
 0x273   : > { %v365_v38 = vadd.f32 1e-05, %v364_v37 }
 0x275   : > { %593 = vrsqrt.f32 %v365_v38 }
 0x282   : > { %v594_v39 = vpop.eup %593 }
 0x283   : > { %v367_v40 = vmul.f32 %v594_v39, %v359_v33 }
 0x285   : > { %v372_v41 = vmul.f32 %v371_v11, %v367_v40 }
 0x287   : > { %v377_v42 = vadd.f32 %v376_v12, %v372_v41 }
 0x289   : > { %378 = vst.msk [vmem:[%s263_s30] sm:$0xff] %vm290_vm0, %v377_v42 }
 0x28a   : > { %690 = shalt.err (!%p687_p9)
}
 0x28b   : > { %s691_s23 = scalar_lea.hbm %s391_s8, 128  ;;  %s695_s13 = scalar_lea.hbm %s999_s4, 256 }
 0x28c   : > { %p692_p1 = scmp.ne.s32.totalorder %s391_s8, %s691_s23  ;;  %p696_p7 = scmp.lt.s32.totalorder %s391_s8, %s999_s4 }
 0x28d   : > { %p697_p11 = scmp.lt.s32.totalorder %s695_s13, %s691_s23 }
 0x28e   : > { %p693_p4 = pnand %p692_p1, %p1015_p10 }
 0x28f   : > { %p698_p8 = por %p697_p11, %p696_p7 }
 0x290   : > { %p694_p6 = pneg %p693_p4 }
 0x292   : > { %p699_p3 = pnand %p698_p8, %p694_p6 }
 0x294   : > { %702 = shalt.err (!%p699_p3)
}
 0x295   : > { %526 = dma.vmem_to_hbm [thread:$0]  (%p1015_p10), %s394_s7, 128, %s391_s8, %s380_s12  }
 0x296 PF: > { %s405_s25 = sand.u32 1, %s737_s15   ;;  %p1016_p2 = scmp.ne.s32.totalorder %s1005_s22, 0 }
 0x297   : > { %p1017_p12 = scmp.ge.s32.totalorder %s749_s18, 2  ;;  %s406_s26 = scalar_lea.sflag [#allocation4], %s405_s25 }
 0x299   : > { %p540_p13 = pnand %p1017_p12, %p1016_p2 }
 0x29b   : > { %p541_p0 = pneg %p540_p13 }
 0x29d   : > { %732 = dma.done.wait (%p541_p0), %s406_s26, 128  }
 0x29e   : > { %734 = vsyncadd (%p541_p0), %s406_s26, 4294967168  ;;  %p20_p5 = scmp.ge.s32.totalorder %s837_s27, 4   ;;  %s1018_s15 = smov %s741_s16 }
 0x29f   : > { %s1019_s16 = smov %s745_s17  ;;  %s1020_s17 = smov %s854_s9 }
 0x2a0   : > { %s1021_s18 = smov %s837_s27  ;;  %22 = sbr.rel (!%p20_p5) target bundleno = 7 (0x7), region = 98 }
 0x2a5   :  { %411 = vsyncpa [#allocation3], 1 }
 0x2a6   :  { %413 = vsyncpa [#allocation3 + $0x1], 1 }
 0x2a7   :  { %414 = vsyncpa [#allocation6], 1 }
 0x2a8   :  { %416 = vsyncpa [#allocation6 + $0x1], 1 }
 0x2a9   :  { %417 = vsyncpa [#allocation4], 1 }
 0x2aa   :  { %419 = vsyncpa [#allocation4 + $0x1], 1 }

// kernel: tpu_custom_call.1
= control target key start
LH: loop header
LB: loop body
LE: loop exit
PB: predicated region body
PF: predicated region fallthrough
CT: control target
= control target key end

     0   :  { %9 = vsyncpa [#allocation3], 0  ;;  %s995_s0 = inlined_call_operand.hbm [shape: bf16[16,32], index: 0, kind: input, shape index: {}]   ;;  %s996_s1 = inlined_call_operand.hbm [shape: f32[16,32], index: 1, kind: input, shape index: {}]   ;;  %s997_s2 = inlined_call_operand.hbm [shape: bf16[32,256], index: 2, kind: input, shape index: {}]   ;;  %s998_s3 = inlined_call_operand.vmem [shape: f32[4,128], index: 3, kind: input, shape index: {}]   ;;  %s999_s4 = inlined_call_operand.hbm [shape: f32[16,32], index: 4, kind: output, shape index: {}]  }
   0x1   :  { %11 = vsyncpa [#allocation3 + $0x1], 0 }
   0x2   :  { %12 = vsyncpa [#allocation6], 0 }
   0x3   :  { %14 = vsyncpa [#allocation6 + $0x1], 0 }
   0x4   :  { %15 = vsyncpa [#allocation4], 0 }
   0x5   :  { %17 = vsyncpa [#allocation4 + $0x1], 0  ;;  %s783_s15 = smov 0   ;;  %s785_s16 = smov 0  }
   0x6   :  { %s787_s17 = smov 0   ;;  %s789_s18 = smov 0  }
   0x7 LB: > { %s804_s19 = sadd.s32 4294967295, %s749_s18   ;;  %s495_s20 = sadd.s32 4294967294, %s749_s18   ;;  %s749_s18 = sphi %s789_s18, %s1021_s18   ;;  %s745_s17 = sphi %s787_s17, %s1020_s17   ;;  %s741_s16 = sphi %s785_s16, %s1019_s16   ;;  %s737_s15 = sphi %s783_s15, %s1018_s15  }
   0x8   : > { %p43_p0 = scmp.ne.s32.totalorder %s741_s16, %s737_s15  ;;  %p1000_p1 = scmp.eq.s32.totalorder %s804_s19, 0 }
   0x9   : > { %p141_p3 = scmp.eq.s32.totalorder %s495_s20, 1  ;;  %p496_p5 = scmp.ge.s32.totalorder %s749_s18, 1 }
   0xa   : > { %p813_p4 = por %p1000_p1, %p43_p0  ;;  %p148_p7 = scmp.lt.s32.totalorder %s749_s18, 3 }
   0xb   : > { %p818_p6 = por %p141_p3, %p43_p0  ;;  %s751_s24 = smov [#allocation7]  }
   0xc   : > { %s1004_s21 = scalar_select %p813_p4, 1, 0 }
   0xd   : > { %s1005_s22 = scalar_select %p818_p6, 1, 0 }
   0xe   : > { %p823_p8 = pnand %p496_p5, %p148_p7  ;;  %s160_s25 = sshll.u32 %s751_s24, 4  ;;  %s161_s25 = int_to_ptr.vmem [resolvable:$true] %s160_s25 }
   0xf   : > { %s837_s27 = sadd.s32 1, %s749_s18   ;;  %s30_s28 = sadd.s32 1, %s745_s17 }
  0x10   : > { %s1006_s23 = scalar_select %p823_p8, 1, 0 }
  0x11   : > { %p528_p9 = pneg %p823_p8  ;;  %s27_s29 = ssub.s32 %s749_s18, %s837_s27 }
  0x12   : > { %s606_s30 = scalar_lea.vmem %s161_s25, 512  ;;  %p614_p5 = scmp.lt.s32.totalorder %s161_s25, %s161_s25 }
  0x13   : > { %p832_p11 = pnand %p528_p9, %p1000_p1  ;;  %p607_p13 = scmp.ne.s32.totalorder %s161_s25, %s606_s30 }
  0x14   : > { %p615_p7 = scmp.lt.s32.totalorder %s606_s30, %s606_s30 }
  0x15   : > { %p597_p12 = pneg %p832_p11 }
  0x16   : > { %p616_p10 = por %p615_p7, %p614_p5 }
  0x17   : > { %p609_p0 = pnand %p607_p13, %p597_p12 }
  0x19   : > { %p610_p3 = pneg %p609_p0 }
  0x1b   : > { %p617_p2 = pnand %p616_p10, %p610_p3 }
  0x1d   : > { %620 = shalt.err (!%p617_p2)
}
  0x1e   : > { %s752_s5 = smov 128   ;;  %s753_s6 = smov 8  }
  0x1f   : > { %531 = dma.hbm_to_vmem [thread:$0]  (!%p832_p11), %s997_s2, 512, %s161_s25, [#allocation6], %s752_s5, %s752_s5, %s753_s6  }
  0x20   : > { %p28_p9 = scmp.eq.s32.totalorder %s27_s29, 0  ;;  %p37_p10 = scmp.ne.s32.totalorder %s745_s17, %s741_s16 }
  0x21   : > { %p38_p2 = scmp.eq.s32.totalorder %s749_s18, 0  ;;  %p544_p12 = scmp.lt.s32.totalorder %s749_s18, 2 }
  0x22   : > { %s854_s9 = scalar_select %p28_p9, %s745_s17, %s30_s28  }
  0x23   : > { %p39_p13 = por %p38_p2, %p37_p10  ;;  %p1008_p0 = scmp.eq.s32.totalorder %s804_s19, 1 }
  0x24   : > { %s863_s11 = sand.u32 1, %s745_s17   ;;  %s500_s12 = sshll.u32 %s749_s18, 6 }
  0x25   : > { %p858_p3 = por %p1008_p0, %p37_p10  ;;  %s499_s13 = sshll.u32 %s863_s11, 2 }
  0x26   : > { %s870_s24 = scalar_lea.hbm %s995_s0, %s500_s12  ;;  %s181_s25 = scalar_lea.vmem [#allocation2], %s499_s13 }
  0x27   : > { %s1009_s10 = scalar_select %p858_p3, 1, 0 }
  0x28   : > { %s188_s26 = sshll.u32 %s181_s25, 4  ;;  %p872_p11 = pnand %p544_p12, %p39_p13  ;;  %s189_s26 = int_to_ptr.vmem [resolvable:$true] %s188_s26 }
  0x29   : > { %s195_s29 = sand.u32 1, %s749_s18   ;;  %s178_s30 = scalar_lea.sflag [#allocation3], %s863_s11 }
  0x2a   : > { %s621_s5 = scalar_lea.hbm %s870_s24, 64  ;;  %p623_p7 = pneg %p872_p11 }
  0x2b   : > { %p622_p5 = scmp.ne.s32.totalorder %s870_s24, %s621_s5  ;;  %s626_s8 = scalar_lea.hbm %s995_s0, 128 }
  0x2c   : > { %p627_p2 = scmp.lt.s32.totalorder %s870_s24, %s995_s0  ;;  %p628_p12 = scmp.lt.s32.totalorder %s626_s8, %s621_s5 }
  0x2d   : > { %p624_p9 = pnand %p623_p7, %p622_p5 }
  0x2e   : > { %p629_p13 = por %p628_p12, %p627_p2 }
  0x2f   : > { %p625_p10 = pneg %p624_p9 }
  0x31   : > { %p630_p0 = pnand %p629_p13, %p625_p10 }
  0x33   : > { %633 = shalt.err (!%p630_p0)
}
  0x34   : > { %s634_s14 = scalar_lea.vmem %s189_s26, 64  ;;  %s754_s20 = smov [#allocation2]  }
  0x35   : > { %p635_p1 = scmp.ne.s32.totalorder %s189_s26, %s634_s14  ;;  %s639_s25 = sshll.u32 %s754_s20, 4  ;;  %s640_s25 = int_to_ptr.vmem [resolvable:$false] %s639_s25 }
  0x36   : > { %s641_s6 = scalar_lea.vmem %s640_s25, 128  ;;  %p642_p9 = scmp.lt.s32.totalorder %s189_s26, %s640_s25 }
  0x37   : > { %p637_p6 = pnand %p635_p1, %p623_p7  ;;  %p643_p3 = scmp.lt.s32.totalorder %s641_s6, %s634_s14 }
  0x39   : > { %p638_p5 = pneg %p637_p6  ;;  %p644_p4 = por %p643_p3, %p642_p9 }
  0x3b   : > { %p645_p8 = pnand %p644_p4, %p638_p5 }
  0x3d   : > { %648 = shalt.err (!%p645_p8)
}
  0x3e   : > { %535 = dma.hbm_to_vmem [thread:$0]  (!%p872_p11), %s870_s24, 64, %s189_s26, %s178_s30  }
  0x3f   : > { %s501_s5 = sshll.u32 %s863_s11, 3  ;;  %s502_s7 = sshll.u32 %s749_s18, 7 }
  0x40   : > { %s903_s13 = scalar_lea.hbm %s996_s1, %s502_s7  ;;  %s199_s14 = scalar_lea.vmem [#allocation5], %s501_s5 }
  0x41   : > { %s206_s20 = sshll.u32 %s199_s14, 4  ;;  %s196_s25 = scalar_lea.sflag [#allocation6], %s195_s29  ;;  %s207_s20 = int_to_ptr.vmem [resolvable:$true] %s206_s20 }
  0x42   : > { %s649_s6 = scalar_lea.hbm %s903_s13, 128  ;;  %s654_s26 = scalar_lea.hbm %s996_s1, 256 }
  0x43   : > { %p650_p1 = scmp.ne.s32.totalorder %s903_s13, %s649_s6  ;;  %p655_p8 = scmp.lt.s32.totalorder %s903_s13, %s996_s1 }
  0x44   : > { %p656_p3 = scmp.lt.s32.totalorder %s654_s26, %s649_s6 }
  0x45   : > { %p652_p4 = pnand %p650_p1, %p623_p7 }
  0x46   : > { %p657_p10 = por %p656_p3, %p655_p8 }
  0x47   : > { %p653_p6 = pneg %p652_p4 }
  0x49   : > { %p658_p2 = pnand %p657_p10, %p653_p6 }
  0x4b   : > { %661 = shalt.err (!%p658_p2)
}
  0x4c   : > { %s662_s5 = scalar_lea.vmem %s207_s20, 128  ;;  %s755_s29 = smov [#allocation5]  }
  0x4d   : > { %p663_p12 = scmp.ne.s32.totalorder %s207_s20, %s662_s5  ;;  %s667_s8 = sshll.u32 %s755_s29, 4  ;;  %s668_s8 = int_to_ptr.vmem [resolvable:$false] %s667_s8 }
  0x4e   : > { %s669_s12 = scalar_lea.vmem %s668_s8, 256  ;;  %p670_p5 = scmp.lt.s32.totalorder %s207_s20, %s668_s8 }
  0x4f   : > { %p665_p13 = pnand %p663_p12, %p623_p7  ;;  %p671_p9 = scmp.lt.s32.totalorder %s669_s12, %s662_s5 }
  0x51   : > { %p666_p0 = pneg %p665_p13  ;;  %p672_p1 = por %p671_p9, %p670_p5 }
  0x53   : > { %p673_p4 = pnand %p672_p1, %p666_p0 }
  0x55   : > { %676 = shalt.err (!%p673_p4)
}
  0x56   : > { %538 = dma.hbm_to_vmem [thread:$0]  (!%p872_p11), %s903_s13, 128, %s207_s20, %s196_s25  }
  0x57   : > { %p1011_p6 = scmp.ne.s32.totalorder %s1006_s23, 0 }
  0x58   : > { %s928_s14 = sand.u32 (!%p1011_p6), 1, %s741_s16   ;;  %p1012_p7 = scmp.ne.s32.totalorder (!%p1011_p6), %s1004_s21, 0 }
  0x59   : > { %215 = sbr.rel (%p1011_p6) target bundleno = 662 (0x296), region = 36  ;;  %s504_s6 = sshll.u32 (!%p1011_p6), %s928_s14, 2 }
  0x5a   : > { %s218_s11 = scalar_lea.sflag (!%p1011_p6), [#allocation3], %s928_s14  ;;  %s221_s24 = scalar_lea.vmem (!%p1011_p6), [#allocation2], %s504_s6 }
  0x5e   : > { %720 = dma.done.wait (%p1012_p7), %s218_s11, 64  }
  0x5f   : > { %722 = vsyncadd (%p1012_p7), %s218_s11, 4294967232  ;;  %s226_s23 = sand.u32 1, %s804_s19   ;;  %s505_s28 = sshll.u32 %s928_s14, 3 }
  0x60   : > { %s227_s13 = scalar_lea.sflag [#allocation6], %s226_s23  ;;  %s940_s20 = scalar_lea.vmem [#allocation5], %s505_s28 }
  0x61   : > { %724 = dma.done.wait (%p1012_p7), %s227_s13, 128  }
  0x62   : > { %726 = vsyncadd (%p1012_p7), %s227_s13, 4294967168  ;;  %p1013_p11 = scmp.eq.s32.totalorder %s804_s19, 0 }
  0x64   : > { %728 = dma.done.wait (%p1013_p11), [#allocation6], 512   ;;  %p1014_p8 = pmov %p1013_p11 }
  0x65   : > { %v756_v0 = vmov 0   ;;  %v583_v1 = vld [vmem:[#allocation7 + $0x14] ss:$8 sps:$4 sm:$0xff]   ;;  %v585_v2 = vld [vmem:[#allocation7 + $0x10] ss:$8 sps:$4 sm:$0xff]   ;;  %vm290_vm0 = vcmask 261120   ;;  %v336_v6 = vlaneseq }
  0x66   : > { %730 = vsyncadd (%p1014_p8), [#allocation6], 4294966784  ;;  %326 = vmatprep.mubr.bf16.mxu0 %v756_v0  ;;  %306 = vmatprep.subr.bf16.mxu0 %v583_v1  ;;  %v586_v3 = vld [vmem:[#allocation7 + $0x4] ss:$8 sps:$4 sm:$0xff]   ;;  %v588_v4 = vld [vmem:[#allocation7] ss:$8 sps:$4 sm:$0xff]  }
  0x67   : > { %307 = vmatpush1.bf16.msra.mxu0 %v585_v2  ;;  %v265_v5 = vld [vmem:[%s221_s24] sm:$0xf]  ;;  %v337_v7 = vshrl.u32 %v336_v6, 7  ;;  %v353_v27 = vld [vmem:[%s940_s20] sm:$0xff]  ;;  %s515_s26 = sshll.u32 %s804_s19, 7  ;;  %s263_s30 = scalar_lea.vmem [#allocation8], %s505_s28 }
  0x68   : > { %308 = vmatprep.subr.bf16.mxu0 %v586_v3  ;;  %v335_v10 = vld [vmem:[%s998_s3] sm:$0xf]  ;;  %s393_s7 = sshll.u32 %s263_s30, 4  ;;  %s391_s8 = scalar_lea.hbm %s999_s4, %s515_s26  ;;  %s394_s7 = int_to_ptr.vmem [resolvable:$true] %s393_s7 }
  0x69   : > { %v370_v8 = vsub.s32 2, %v337_v7  ;;  %v375_v9 = vsub.s32 3, %v337_v7  ;;  %v338_v13 = vsub.s32 0, %v337_v7  ;;  %v343_v23 = vsub.s32 1, %v337_v7  ;;  %s380_s12 = scalar_lea.sflag [#allocation4], %s928_s14  ;;  %s677_s6 = scalar_lea.vmem %s394_s7, 128 }
  0x6a   : > { %p678_p3 = scmp.ne.s32.totalorder %s394_s7, %s677_s6  ;;  %p1015_p10 = scmp.ne.s32.totalorder %s1009_s10, 0 }
  0x6b   : > { %309 = vmatpush1.bf16.msra.mxu0 %v588_v4  ;;  %v371_v11 = vrot.slane %v335_v10, %v370_v8  ;;  %v376_v12 = vrot.slane %v335_v10, %v375_v9  ;;  %v339_v14 = vrot.slane %v335_v10, %v338_v13  ;;  %v344_v24 = vrot.slane %v335_v10, %v343_v23  ;;  %s757_s11 = smov [#allocation8]  }
  0x6c   : > { %p679_p2 = pnand %p678_p3, %p1015_p10  ;;  %s681_s19 = sshll.u32 %s757_s11, 4  ;;  %s682_s19 = int_to_ptr.vmem [resolvable:$false] %s681_s19 }
  0x6d   : > { %s683_s24 = scalar_lea.vmem %s682_s19, 256  ;;  %p684_p13 = scmp.lt.s32.totalorder %s394_s7, %s682_s19 }
  0x6e   : > { %512 = vmatmul.mubr.msk.bf16.vlgmr.msra.gmra.mxu0 %vm290_vm0, %v265_v5  ;;  %p680_p12 = pneg %p679_p2  ;;  %p685_p0 = scmp.lt.s32.totalorder %s683_s24, %s677_s6 }
  0x70   : > { %p686_p5 = por %p685_p0, %p684_p13 }
  0x72   : > { %p687_p9 = pnand %p686_p5, %p680_p12 }
 0x12e   : > { %v328_v15 = vpop.f32.mrf.mxu0 }
 0x12f   : > { %v340_v16 = vadd.f32 %v339_v14, %v328_v15 }
 0x130   : > { %v330_v17 = vpop.f32.mrf.mxu0 }
 0x131   : > { %v513_v18 = vmul.f32 -1.442695, %v340_v16  ;;  %v345_v25 = vadd.f32 %v344_v24, %v330_v17 }
 0x132   : > { %v332_v19 = vpop.f32.mrf.mxu0 }
 0x133   : > { %589 = vpow2.f32 %v513_v18 }
 0x134   : > { %v333_v20 = vpop.f32.mrf.mxu0 }
 0x140   : > { %v590_v21 = vpop.eup %589 }
 0x141   : > { %v349_v22 = vadd.f32 1.0, %v590_v21 }
 0x143   : > { %591 = vrcp.f32 %v349_v22 }
 0x150   : > { %v592_v26 = vpop.eup %591 }
 0x151   : > { %v352_v28 = vmul.f32 %v592_v26, %v345_v25 }
 0x153   : > { %v354_v29 = vadd.f32 %v353_v27, %v352_v28 }
 0x155   : > { %v355_v30 = vsel %vm290_vm0, %v354_v29, 0.0 }
 0x156   : > { %356 = vadd.xlane.f32.xlu0 %v355_v30 }
 0x1df   : > { %v357_v31 = vpop.xlane.xlu0 %356 }
 0x1e0   : > { %v358_v32 = vmul.f32 0.03125, %v357_v31 }
 0x1e2   : > { %v359_v33 = vsub.f32 %v354_v29, %v358_v32 }
 0x1e4   : > { %v360_v34 = vmul.f32 %v359_v33, %v359_v33 }
 0x1e6   : > { %v361_v35 = vsel %vm290_vm0, %v360_v34, 0.0 }
 0x1e7   : > { %362 = vadd.xlane.f32.xlu0 %v361_v35 }
 0x270   : > { %v363_v36 = vpop.xlane.xlu0 %362 }
 0x271   : > { %v364_v37 = vmul.f32 0.03125, %v363_v36 }
 0x273   : > { %v365_v38 = vadd.f32 1e-05, %v364_v37 }
 0x275   : > { %593 = vrsqrt.f32 %v365_v38 }
 0x282   : > { %v594_v39 = vpop.eup %593 }
 0x283   : > { %v367_v40 = vmul.f32 %v594_v39, %v359_v33 }
 0x285   : > { %v372_v41 = vmul.f32 %v371_v11, %v367_v40 }
 0x287   : > { %v377_v42 = vadd.f32 %v376_v12, %v372_v41 }
 0x289   : > { %378 = vst.msk [vmem:[%s263_s30] sm:$0xff] %vm290_vm0, %v377_v42 }
 0x28a   : > { %690 = shalt.err (!%p687_p9)
}
 0x28b   : > { %s691_s23 = scalar_lea.hbm %s391_s8, 128  ;;  %s695_s13 = scalar_lea.hbm %s999_s4, 256 }
 0x28c   : > { %p692_p1 = scmp.ne.s32.totalorder %s391_s8, %s691_s23  ;;  %p696_p7 = scmp.lt.s32.totalorder %s391_s8, %s999_s4 }
 0x28d   : > { %p697_p11 = scmp.lt.s32.totalorder %s695_s13, %s691_s23 }
 0x28e   : > { %p693_p4 = pnand %p692_p1, %p1015_p10 }
 0x28f   : > { %p698_p8 = por %p697_p11, %p696_p7 }
 0x290   : > { %p694_p6 = pneg %p693_p4 }
 0x292   : > { %p699_p3 = pnand %p698_p8, %p694_p6 }
 0x294   : > { %702 = shalt.err (!%p699_p3)
}
 0x295   : > { %526 = dma.vmem_to_hbm [thread:$0]  (%p1015_p10), %s394_s7, 128, %s391_s8, %s380_s12  }
 0x296 PF: > { %s405_s25 = sand.u32 1, %s737_s15   ;;  %p1016_p2 = scmp.ne.s32.totalorder %s1005_s22, 0 }
 0x297   : > { %p1017_p12 = scmp.ge.s32.totalorder %s749_s18, 2  ;;  %s406_s26 = scalar_lea.sflag [#allocation4], %s405_s25 }
 0x299   : > { %p540_p13 = pnand %p1017_p12, %p1016_p2 }
 0x29b   : > { %p541_p0 = pneg %p540_p13 }
 0x29d   : > { %732 = dma.done.wait (%p541_p0), %s406_s26, 128  }
 0x29e   : > { %734 = vsyncadd (%p541_p0), %s406_s26, 4294967168  ;;  %p20_p5 = scmp.ge.s32.totalorder %s837_s27, 4   ;;  %s1018_s15 = smov %s741_s16 }
 0x29f   : > { %s1019_s16 = smov %s745_s17  ;;  %s1020_s17 = smov %s854_s9 }
 0x2a0   : > { %s1021_s18 = smov %s837_s27  ;;  %22 = sbr.rel (!%p20_p5) target bundleno = 7 (0x7), region = 98 }
 0x2a5   :  { %411 = vsyncpa [#allocation3], 1 }
 0x2a6   :  { %413 = vsyncpa [#allocation3 + $0x1], 1 }
 0x2a7   :  { %414 = vsyncpa [#allocation6], 1 }
 0x2a8   :  { %416 = vsyncpa [#allocation6 + $0x1], 1 }
 0x2a9   :  { %417 = vsyncpa [#allocation4], 1 }
 0x2aa   :  { %419 = vsyncpa [#allocation4 + $0x1], 1 }

</bundles_post_ra>
